<compile_context>
chip_gen: v7x
topology: tpu7x:2x2x1
jax: 0.10.0
libtpu: 0.0.40
codegen_flags: <defaults>
</compile_context>

<pallas_src>
import jax
import jax.numpy as jnp
from jax import lax
from jax.experimental import pallas as pl
from jax.experimental.pallas import tpu as pltpu


def _round_up(x, m):
    return (x + m - 1) // m * m


def _reward_criterion_kernel(seq_ref, w_ref, logp_ref, out_ref, acc_ref):
    """Grid = (row_tiles, vocab_tiles); vocab is the reduction axis (last)."""
    k = pl.program_id(1)

    @pl.when(k == 0)
    def _():
        acc_ref[...] = jnp.zeros_like(acc_ref)

    seq = seq_ref[...]                              # (TM, 1) int32 (padded rows == -1)
    logp = logp_ref[...].astype(jnp.float32)        # (TM, TV), upcast per tile
    tm, tv = logp.shape

    # Per-tile 2D one-hot via the GLOBAL vocab index (tile offset + local iota).
    # Padded vocab lanes (>= V) and padded rows (seq == -1) can never match.
    vocab_ids = lax.broadcasted_iota(jnp.int32, (tm, tv), 1) + k * tv
    hit = vocab_ids == seq                          # (TM, TV) bool

    # NaN-safe select (never multiply -inf / boundary garbage by 0), then lane-reduce.
    acc_ref[...] += jnp.sum(jnp.where(hit, logp, 0.0), axis=1, keepdims=True)

    @pl.when(k == pl.num_programs(1) - 1)
    def _():
        # w = -(reward * mask); padded rows carry w == 0.
        partial = jnp.sum(w_ref[...] * acc_ref[...], keepdims=True)       # (1, 1)
        out_ref[...] = jnp.broadcast_to(partial, out_ref.shape).astype(out_ref.dtype)


def reward_criterion(logp, seq, reward, reduction="mean", *, tm=256, tv=2048):
    """Pallas implementation of RewardCriterion.forward(input, seq, reward, 'mean')."""
    if reduction != "mean":
        # TODO(synk): reduction='none' (per-sequence normalized sums) not implemented in-kernel.
        raise NotImplementedError("only reduction='mean' is implemented")

    N, L, V = logp.shape
    NL = N * L

    seq = seq.astype(jnp.int32).reshape(N, L)
    reward = reward.reshape(N, L).astype(jnp.float32)

    # Tiny (N, L) prep hoisted out of the hot loop: shifted mask + fused weight + denom.
    mask = (seq > 0).astype(jnp.float32)
    mask = jnp.concatenate([jnp.ones((N, 1), jnp.float32), mask[:, : L - 1]], axis=1)
    w = -(reward * mask)                            # (N, L)
    denom = jnp.sum(mask)

    # Tile sizes: lane-dense vocab axis, sublane-aligned row axis.
    TM = min(_round_up(tm, 8), _round_up(NL, 8))
    TV = min(_round_up(tv, 128), _round_up(V, 128))
    NL_pad = _round_up(NL, TM)
    n_row_tiles = NL_pad // TM
    n_vocab_tiles = pl.cdiv(V, TV)

    # logp streamed in its native dtype (no wrapper upcast — half the bytes for bf16).
    logp2d = logp.reshape(NL, V)

    # Pad the tiny per-row arrays so padded rows never contribute:
    # seq = -1 never matches a vocab id; w = 0 kills any leak.
    seq_p = jnp.pad(seq.reshape(NL, 1), ((0, NL_pad - NL), (0, 0)), constant_values=-1)
    w_p = jnp.pad(w.reshape(NL, 1), ((0, NL_pad - NL), (0, 0)), constant_values=0.0)

    out = pl.pallas_call(
        _reward_criterion_kernel,
        out_shape=jax.ShapeDtypeStruct((n_row_tiles * 8, 128), jnp.float32),
        grid_spec=pltpu.PrefetchScalarGridSpec(
            num_scalar_prefetch=0,
            grid=(n_row_tiles, n_vocab_tiles),
            in_specs=[
                pl.BlockSpec((TM, 1), lambda i, k: (i, 0)),    # seq (resident per row tile)
                pl.BlockSpec((TM, 1), lambda i, k: (i, 0)),    # weight
                pl.BlockSpec((TM, TV), lambda i, k: (i, k)),   # logp (streamed)
            ],
            out_specs=pl.BlockSpec((8, 128), lambda i, k: (i, 0)),
            scratch_shapes=[pltpu.VMEM((TM, 1), jnp.float32)],
        ),
        compiler_params=pltpu.CompilerParams(
            dimension_semantics=("parallel", "arbitrary"),
        ),
        cost_estimate=pl.CostEstimate(
            flops=3 * NL * V,
            transcendentals=0,
            bytes_accessed=NL * V * logp.dtype.itemsize
            + NL_pad * 8
            + n_row_tiles * 8 * 128 * 4,
        ),
    )(seq_p, w_p, logp2d)

    numer = jnp.sum(out[::8, 0])                    # one partial sum per row tile
    return numer / denom


def _reference(logp, seq, reward):
    N, L, V = logp.shape
    gathered = jnp.take_along_axis(logp.astype(jnp.float32), seq[:, :, None], axis=2)[..., 0]
    mask = (seq > 0).astype(jnp.float32)
    mask = jnp.concatenate([jnp.ones((N, 1), jnp.float32), mask[:, :-1]], axis=1)
    out = -gathered * reward.reshape(N, L) * mask
    return jnp.sum(out) / jnp.sum(mask)


if __name__ == "__main__":
    key = jax.random.PRNGKey(0)
    k1, k2, k3, k4, k5, k6 = jax.random.split(key, 6)

    # Case 1: small shapes matching the module's typical usage.
    N, L, V = 2, 8, 32
    logits = jax.random.normal(k1, (N, L, V), dtype=jnp.float32)
    logp = jax.nn.log_softmax(logits, axis=-1)
    seq = jax.random.randint(k2, (N, L), minval=0, maxval=V, dtype=jnp.int32)
    seq = seq.at[0, 5:].set(0).at[1, 3:].set(0)
    reward = jax.random.normal(k3, (N, L), dtype=jnp.float32)

    loss = jax.block_until_ready(reward_criterion(logp, seq, reward))
    ref = _reference(logp, seq, reward)
    assert jnp.allclose(loss, ref, atol=1e-5, rtol=1e-5), (loss, ref)

    # Case 2: ragged shapes + multi-tile grid (exercises row/vocab padding and
    # the vocab-axis accumulator) with deliberately small tiles.
    N2, L2, V2 = 3, 13, 300
    logits2 = jax.random.normal(k4, (N2, L2, V2), dtype=jnp.float32)
    logp2 = jax.nn.log_softmax(logits2, axis=-1)
    seq2 = jax.random.randint(k5, (N2, L2), minval=0, maxval=V2, dtype=jnp.int32)
    seq2 = seq2.at[0, 9:].set(0).at[2, 4:].set(0)
    reward2 = jax.random.normal(k6, (N2, L2), dtype=jnp.float32)

    loss2 = jax.block_until_ready(reward_criterion(logp2, seq2, reward2, tm=8, tv=128))
    ref2 = _reference(logp2, seq2, reward2)
    assert jnp.allclose(loss2, ref2, atol=1e-5, rtol=1e-5), (loss2, ref2)

    print("KERNEL_OK")
</pallas_src>

<mosaic_0001>
module attributes {stable_mosaic.version = 11 : i64} {
  func.func @_reward_criterion_kernel(%arg0: i32, %arg1: i32, %arg2: memref<16x1xi32, #tpu.memory_space<vmem>>, %arg3: memref<16x1xf32, #tpu.memory_space<vmem>>, %arg4: memref<16x128xf32, #tpu.memory_space<vmem>>, %arg5: memref<8x128xf32, #tpu.memory_space<vmem>>, %arg6: memref<16x1xf32, #tpu.memory_space<vmem>>) attributes {dimension_semantics = [#tpu.dimension_semantics<parallel>, #tpu.dimension_semantics<arbitrary>], iteration_bounds = array<i64: 1, 1>, scalar_prefetch = 0 : i64, scratch_operands = 1 : i64, tpu.core_type = #tpu.core_type<tc>, window_params = [{transform_indices = @transform_0, window_bounds = array<i64: 16, 1>}, {transform_indices = @transform_1, window_bounds = array<i64: 16, 1>}, {transform_indices = @transform_2, window_bounds = array<i64: 16, 128>}, {transform_indices = @transform_3, window_bounds = array<i64: 8, 128>}]} {
    %c0_i32 = arith.constant 0 : i32
    %0 = arith.cmpi eq, %arg1, %c0_i32 : i32
    %1 = arith.extui %0 : i1 to i32
    %c0_i32_0 = arith.constant 0 : i32
    %2 = arith.cmpi ne, %1, %c0_i32_0 : i32
    scf.if %2 {
      %cst_11 = arith.constant 0.000000e+00 : f32
      %21 = vector.broadcast %cst_11 : f32 to vector<16x1xf32>
      %c0_12 = arith.constant 0 : index
      %c0_13 = arith.constant 0 : index
      %22 = vector.load %arg6[%c0_12, %c0_13] : memref<16x1xf32, #tpu.memory_space<vmem>>, vector<16x1xf32>
      tpu.vector_store %arg6[%c0_12, %c0_13], %21 {strides = array<i32>} : memref<16x1xf32, #tpu.memory_space<vmem>>, vector<16x1xf32>,
    } else {
    }
    %c0 = arith.constant 0 : index
    %c0_1 = arith.constant 0 : index
    %3 = vector.load %arg2[%c0, %c0_1] : memref<16x1xi32, #tpu.memory_space<vmem>>, vector<16x1xi32>
    %c0_2 = arith.constant 0 : index
    %c0_3 = arith.constant 0 : index
    %4 = vector.load %arg4[%c0_2, %c0_3] : memref<16x128xf32, #tpu.memory_space<vmem>>, vector<16x128xf32>
    %5 = tpu.iota {dimensions = array<i32: 1>} : vector<16x128xi32>
    %c128_i32 = arith.constant 128 : i32
    %6 = arith.muli %arg1, %c128_i32 : i32
    %7 = vector.broadcast %6 : i32 to vector<16x128xi32>
    %8 = arith.addi %5, %7 : vector<16x128xi32>
    %9 = vector.broadcast %3 : vector<16x1xi32> to vector<16x128xi32>
    %10 = arith.cmpi eq, %8, %9 : vector<16x128xi32>
    %c0_4 = arith.constant 0 : index
    %c0_5 = arith.constant 0 : index
    %11 = vector.load %arg6[%c0_4, %c0_5] : memref<16x1xf32, #tpu.memory_space<vmem>>, vector<16x1xf32>
    %cst = arith.constant 0.000000e+00 : f32
    %12 = vector.broadcast %cst : f32 to vector<16x128xf32>
    %13 = arith.select %10, %4, %12 : vector<16x128xi1>, vector<16x128xf32>
    %cst_6 = arith.constant dense<0.000000e+00> : vector<16xf32>
    %14 = vector.multi_reduction <add>, %13, %cst_6 [1] : vector<16x128xf32> to vector<16xf32>
    %15 = vector.shape_cast %14 : vector<16xf32> to vector<16x1xf32>
    %16 = arith.addf %11, %15 : vector<16x1xf32>
    %c0_7 = arith.constant 0 : index
    %c0_8 = arith.constant 0 : index
    %17 = vector.load %arg6[%c0_7, %c0_8] : memref<16x1xf32, #tpu.memory_space<vmem>>, vector<16x1xf32>
    tpu.vector_store %arg6[%c0_7, %c0_8], %16 {strides = array<i32>} : memref<16x1xf32, #tpu.memory_space<vmem>>, vector<16x1xf32>,
    %c0_i32_9 = arith.constant 0 : i32
    %18 = arith.cmpi eq, %arg1, %c0_i32_9 : i32
    %19 = arith.extui %18 : i1 to i32
    %c0_i32_10 = arith.constant 0 : i32
    %20 = arith.cmpi ne, %19, %c0_i32_10 : i32
    scf.if %20 {
      %c0_11 = arith.constant 0 : index
      %c0_12 = arith.constant 0 : index
      %21 = vector.load %arg3[%c0_11, %c0_12] : memref<16x1xf32, #tpu.memory_space<vmem>>, vector<16x1xf32>
      %c0_13 = arith.constant 0 : index
      %c0_14 = arith.constant 0 : index
      %22 = vector.load %arg6[%c0_13, %c0_14] : memref<16x1xf32, #tpu.memory_space<vmem>>, vector<16x1xf32>
      %23 = arith.mulf %21, %22 : vector<16x1xf32>
      %24 = vector.shape_cast %23 : vector<16x1xf32> to vector<1x16x1xf32>
      %cst_15 = arith.constant dense<0.000000e+00> : vector<1xf32>
      %25 = vector.multi_reduction <add>, %24, %cst_15 [1, 2] : vector<1x16x1xf32> to vector<1xf32>
      %26 = vector.shape_cast %25 : vector<1xf32> to vector<1x1x1xf32>
      %27 = vector.extract %26[0, 0, 0] : f32 from vector<1x1x1xf32>
      %28 = vector.broadcast %27 : f32 to vector<1x1xf32>
      %29 = vector.shape_cast %28 : vector<1x1xf32> to vector<1x1xf32>
      %30 = vector.broadcast %29 : vector<1x1xf32> to vector<8x128xf32>
      %c0_16 = arith.constant 0 : index
      %c0_17 = arith.constant 0 : index
      %31 = vector.load %arg5[%c0_16, %c0_17] : memref<8x128xf32, #tpu.memory_space<vmem>>, vector<8x128xf32>
      tpu.vector_store %arg5[%c0_16, %c0_17], %30 {strides = array<i32>} : memref<8x128xf32, #tpu.memory_space<vmem>>, vector<8x128xf32>,
    } else {
    }
    return
  }
  func.func @transform_0(%arg0: i32, %arg1: i32) -> (i32, i32) {
    %c0_i32 = arith.constant 0 : i32
    %c0_i32_0 = arith.constant 0 : i32
    return %arg0, %c0_i32 : i32, i32
  }
  func.func @transform_1(%arg0: i32, %arg1: i32) -> (i32, i32) {
    %c0_i32 = arith.constant 0 : i32
    %c0_i32_0 = arith.constant 0 : i32
    return %arg0, %c0_i32 : i32, i32
  }
  func.func @transform_2(%arg0: i32, %arg1: i32) -> (i32, i32) {
    %c0_i32 = arith.constant 0 : i32
    return %arg0, %arg1 : i32, i32
  }
  func.func @transform_3(%arg0: i32, %arg1: i32) -> (i32, i32) {
    %c0_i32 = arith.constant 0 : i32
    %c0_i32_0 = arith.constant 0 : i32
    return %arg0, %c0_i32 : i32, i32
  }
}

</mosaic_0001>

<bundles_post_ra>
// kernel: tpu_custom_call.1
= control target key start
LH: loop header
LB: loop body
LE: loop exit
PB: predicated region body
PF: predicated region fallthrough
CT: control target
= control target key end

     0   :  { %s178_s0 = inlined_call_operand.vmem [shape: s32[16,1], index: 0, kind: input, shape index: {}]   ;;  %s179_s1 = inlined_call_operand.vmem [shape: f32[16,1], index: 1, kind: input, shape index: {}]   ;;  %s180_s2 = inlined_call_operand.vmem [shape: f32[16,32], index: 2, kind: input, shape index: {}]   ;;  %s181_s3 = inlined_call_operand.hbm [shape: f32[8,128], index: 3, kind: output, shape index: {}]  }
   0x1   :  { %v22_v0 = vld [vmem:[%s178_s0] sm:$0xff] }
   0x2   :  { %8 = vsyncpa [#allocation4], 0  ;;  %v119_v1 = vmov 0   ;;  %v23_v2 = vld [vmem:[%s178_s0 + $0x8] sm:$0xff]  ;;  %v26_v3 = vlaneseq  ;;  %v24_v5 = vld [vmem:[%s180_s2] sm:$0xff]  ;;  %vm19_vm2 = vcmask 7168  }
   0x3   :  { %94 = vset.pattern.permute.xlu0 %v119_v1  ;;  %v25_v8 = vld [vmem:[%s180_s2 + $0x8] sm:$0xff]  ;;  %v120_v11 = vmov 0.0   ;;  %v55_v18 = vld [vmem:[%s179_s1] sm:$0xff]  ;;  %s121_s22 = smov [#allocation3]  }
   0x4   :  { %32 = vperm.xlu0 %94, %v22_v0   ;;  %v27_v4 = vand.u32 127, %v26_v3  ;;  %20 = vst.msk [vmem:[#allocation2] sm:$0xff] %vm19_vm2, %v120_v11  ;;  %21 = vst.msk [vmem:[#allocation2 + $0x8] sm:$0xff] %vm19_vm2, %v120_v11  ;;  %v56_v20 = vld [vmem:[%s179_s1 + $0x8] sm:$0xff]  ;;  %s81_s23 = sshll.u32 %s121_s22, 4  ;;  %s82_s23 = int_to_ptr.vmem [resolvable:$true] %s81_s23 }
   0x5   :  { %s95_s24 = scalar_lea.vmem %s82_s23, 128  ;;  %p100_p1 = scmp.lt.s32.totalorder %s82_s23, %s82_s23 }
   0x6   :  { %p96_p0 = scmp.ne.s32.totalorder %s82_s23, %s95_s24  ;;  %p101_p2 = scmp.lt.s32.totalorder %s95_s24, %s95_s24 }
   0x8   :  { %35 = vperm.xlu0 %94, %v23_v2   ;;  %p102_p3 = por %p101_p2, %p100_p1 }
   0xa   :  { %p103_p4 = pnand %p102_p3, %p96_p0 }
   0xb   :  { %v39_v12 = vld [vmem:[#allocation2] sm:$0xff]  ;;  %v40_v15 = vld [vmem:[#allocation2 + $0x8] sm:$0xff] }
  0x83   :  { %v33_v6 = vpop.permute.xlu0 %32 }
  0x84   :  { %vm37_vm0 = vcmp.eq.s32.totalorder %v27_v4, %v33_v6 }
  0x85   :  { %v41_v7 = vsel %vm37_vm0, %v24_v5, 0.0 }
  0x86   :  { %43 = vadd.xlane.f32.xlu1 %v41_v7 }
  0x87   :  { %v36_v9 = vpop.permute.xlu0 %35 }
  0x88   :  { %vm38_vm1 = vcmp.eq.s32.totalorder %v27_v4, %v36_v9 }
  0x89   :  { %v42_v10 = vsel %vm38_vm1, %v25_v8, 0.0 }
  0x8a   :  { %45 = vadd.xlane.f32.xlu1 %v42_v10 }
 0x113   :  { %v44_v13 = vpop.xlane.xlu1 %43 }
 0x114   :  { %v47_v14 = vadd.f32 %v44_v13, %v39_v12 }
 0x116   :  { %50 = vst.msk [vmem:[#allocation2] sm:$0xff] %vm19_vm2, %v47_v14 }
 0x117   :  { %v46_v16 = vpop.xlane.xlu1 %45 }
 0x118   :  { %v48_v17 = vadd.f32 %v46_v16, %v40_v15 }
 0x11a   :  { %51 = vst.msk [vmem:[#allocation2 + $0x8] sm:$0xff] %vm19_vm2, %v48_v17 }
 0x11d   :  { %v57_v19 = vld [vmem:[#allocation2] sm:$0xff] }
 0x11e   :  { %v59_v21 = vmul.f32 %v57_v19, %v55_v18 }
 0x120   :  { %v61_v24 = vsel %vm19_vm2, %v59_v21, 0.0 }
 0x121   :  { %v58_v22 = vld [vmem:[#allocation2 + $0x8] sm:$0xff] }
 0x122   :  { %v60_v23 = vmul.f32 %v58_v22, %v56_v20 }
 0x124   :  { %v62_v25 = vsel %vm19_vm2, %v60_v23, 0.0 }
 0x125   :  { %v63_v26 = vadd.f32 %v62_v25, %v61_v24 }
 0x127   :  { %64 = vadd.xlane.f32.xlu0 %v63_v26 }
 0x1b4   :  { %v65_v27 = vpop.xlane.xlu0 %64 }
 0x1b5   :  { %v66_v28 = vrot.slane %v65_v27, 4 }
 0x1b7   :  { %v67_v29 = vadd.f32 %v66_v28, %v65_v27 }
 0x1b9   :  { %v68_v30 = vrot.slane %v67_v29, 2 }
 0x1bb   :  { %v69_v31 = vadd.f32 %v68_v30, %v67_v29 }
 0x1bd   :  { %v70_v32 = vrot.slane %v69_v31, 1 }
 0x1bf   :  { %v71_v33 = vadd.f32 %v70_v32, %v69_v31 }
 0x1c1   :  { %89 = vpush %v71_v33 }
 0x1f2   :  { %s90_s1 = spop %89 }
 0x1f3   :  { %v73_v34 = vstv %s90_s1 }
 0x1f4   :  { %74 = vst [vmem:[#allocation3] sm:$0xff] %v73_v34 }
 0x1f5   :  { %106 = shalt.err (!%p103_p4)
}
 0x1f6   :  { %s107_s27 = scalar_lea.hbm %s181_s3, 128 }
 0x1f7   :  { %p108_p5 = scmp.ne.s32.totalorder %s181_s3, %s107_s27  ;;  %p111_p6 = scmp.lt.u32.totalorder %s107_s27, %s181_s3 }
 0x1f9   :  { %p113_p7 = pnand %p111_p6, %p108_p5 }
 0x1fb   :  { %116 = shalt.err (!%p113_p7)
}
 0x1fc   :  { %84 = dma.vmem_to_hbm [thread:$0]  %s82_s23, 128, %s181_s3, [#allocation4]  }
 0x1fd   :  { %117 = dma.done.wait [#allocation4], 128  }
 0x1fe   :  { %118 = vsyncadd [#allocation4], 4294967168 }
 0x1ff   :  { %88 = vsyncpa [#allocation4], 1 }

</bundles_post_ra>
